<compile_context>
chip_gen: v6e
topology: v6e:2x2x1
jax: 0.10.0
libtpu: 0.0.40
codegen_flags: <defaults>
</compile_context>

<pallas_src>
import jax
import jax.numpy as jnp
from jax import lax
from jax.experimental import pallas as pl
from jax.experimental.pallas import tpu as pltpu

EPS = 1e-5  # PyTorch BatchNorm1d default eps

# contract the LAST dim of both operands: (a, k) x (b, k) -> (a, b)
_TRANS_B_DIMS = (((1,), (1,)), ((), ()))


def _geodesic_kernel(x_ref, wc_ref, b1_ref, w2_ref, b2_ref, o_ref):
    # x_ref: (1, tn, 12K) ; o_ref: (1, out_ch, tn)
    x = x_ref[0].astype(jnp.float32)                          # (tn, feat)

    # Shift left by 3 lanes (the wrap-around lanes land on lane%12 in {9,10,11}
    # which the mask below never selects, so they can never contribute).
    xshift = jnp.concatenate([x[:, 3:], x[:, :3]], axis=1)    # (tn, feat)
    lane = lax.broadcasted_iota(jnp.int32, x.shape, 1)
    edge_lane = (lane % 12) < 3                               # lanes holding v0_c
    # edge lanes -> |v0_c - v1_c|; every other lane keeps raw x (the v1 lanes
    # 3..5 are matched with zero weight rows below).
    xmod = jnp.where(edge_lane, jnp.abs(x - xshift), x)
    xmod = xmod.astype(wc_ref.dtype)                          # bf16 for the MXU

    # Layer 1: rebuild + Conv1d(3->mid, k=3, s=3) + sum-over-K + BN1 folded
    # into a single channels-first matmul: (mid, 12K) x (tn, 12K)^T -> (mid, tn)
    h = lax.dot_general(wc_ref[...], xmod, _TRANS_B_DIMS,
                        preferred_element_type=jnp.float32) + b1_ref[...]
    h = jnp.maximum(h, 0.0).astype(w2_ref.dtype)              # (mid, tn), bf16

    # Layer 2: Conv1d(mid->out, k=1) + BN2, channels-first -> lane-dense store.
    y = jnp.dot(w2_ref[...], h,
                preferred_element_type=jnp.float32) + b2_ref[...]  # (out_ch, tn)
    o_ref[0] = jnp.maximum(y, 0.0).astype(o_ref.dtype)


def geodesic_forward(data, params, *, compute_dtype=jnp.bfloat16):
    """data: (B, N, K, 12) float; returns (B, out_channels, N) like PyTorch."""
    B, N, K, F = data.shape
    assert F == 12, "last dim must be 12 (v0, v1, face-edge, normal)"
    mid = params["w1"].shape[0]
    out_ch = params["w2"].shape[0]
    feat = K * F

    # ---- fold eval-mode BatchNorm into the conv weights / biases ----
    # TODO(synk): BatchNorm1d is implemented in inference mode (running stats),
    #             not training-mode batch statistics.
    scale1 = params["g1"] / jnp.sqrt(params["v1"] + EPS)                      # (mid,)
    w1_eff = params["w1"].astype(jnp.float32) * scale1[:, None, None]         # (mid, 3, 3)
    b1_eff = (params["b1"] - params["m1"]) * scale1 + params["be1"]           # (mid,)

    scale2 = params["g2"] / jnp.sqrt(params["v2"] + EPS)                      # (out,)
    w2_eff = params["w2"][:, :, 0].astype(jnp.float32) * scale2[:, None]      # (out, mid)
    b2_eff = (params["b2"] - params["m2"]) * scale2 + params["be2"]           # (out,)

    # ---- single combined layer-1 weight (per 12-lane group) ----
    #   lanes 0..2  -> |v0 - v1| (edge)  -> w1[:, :, 0]
    #   lanes 3..5  -> v1 (raw x)        -> 0   (only enters through the edge term)
    #   lanes 6..8  -> face edge         -> w1[:, :, 1]
    #   lanes 9..11 -> normal            -> w1[:, :, 2]
    zero3 = jnp.zeros((3, mid), jnp.float32)
    blk = jnp.concatenate([w1_eff[:, :, 0].T, zero3,
                           w1_eff[:, :, 1].T, w1_eff[:, :, 2].T], axis=0)     # (12, mid)
    wc = jnp.tile(blk, (K, 1)).T.astype(compute_dtype)                        # (mid, 12K)
    w2 = w2_eff.astype(compute_dtype)                                         # (out, mid)
    b1_col = b1_eff.reshape(mid, 1).astype(jnp.float32)
    b2_col = b2_eff.reshape(out_ch, 1).astype(jnp.float32)

    # Keep the caller's activation dtype (bf16 inputs halve the HBM read); the
    # kernel upcasts to f32 for the |v0-v1| prelude and feeds the MXU bf16.
    x = data.reshape(B, N, feat)

    # ---- tiling: faces on the lane axis of the output, big tiles first ----
    LANE = 128
    tn = None
    for cand in (4096, 2048, 1024, 512, 256, LANE):    # prefer tn that divides N
        if N % cand == 0:
            tn = cand
            break
    if tn is None and N <= 4096:
        tn = N                    # single ragged tile == full dim: no pad/slice
    if tn is not None:
        N_pad = N
    else:
        # fallback for large N not divisible by 128: pad (adds an HBM pass)
        tn = 2048
        while tn > LANE and (-N) % tn > max(N // 8, LANE):
            tn //= 2
        N_pad = pl.cdiv(N, tn) * tn
        x = jnp.pad(x, ((0, 0), (0, N_pad - N), (0, 0)))

    def full_spec(shape):
        return pl.BlockSpec(shape, lambda b, j: (0,) * len(shape))

    out = pl.pallas_call(
        _geodesic_kernel,
        out_shape=jax.ShapeDtypeStruct((B, out_ch, N_pad), jnp.float32),
        grid=(B, N_pad // tn),
        in_specs=[
            pl.BlockSpec((1, tn, feat), lambda b, j: (b, j, 0)),  # x tile
            full_spec((mid, feat)),                               # wc (folded L1+BN1)
            full_spec((mid, 1)),                                  # b1 (folded)
            full_spec((out_ch, mid)),                             # w2 (folded L2+BN2)
            full_spec((out_ch, 1)),                               # b2 (folded)
        ],
        out_specs=pl.BlockSpec((1, out_ch, tn), lambda b, j: (b, 0, j)),
        compiler_params=pltpu.CompilerParams(
            dimension_semantics=("parallel", "parallel")),
    )(x, wc, b1_col, w2, b2_col)

    if N_pad != N:
        # padded face columns carry ReLU(folded biases); slice them off
        out = out[:, :, :N]
    return out


def geodesic_reference(data, params):
    """Pure-JAX reference following the PyTorch code literally (BN in eval mode)."""
    B, N, K, _ = data.shape
    edges_c = jnp.abs(data[..., :3] - data[..., 3:6])
    faedge = data[..., 6:9]
    norms = data[..., 9:]
    first = jnp.sum(edges_c, axis=2)[:, :, None, :]
    second = jnp.sum(faedge, axis=2)[:, :, None, :]
    third = jnp.sum(norms, axis=2)[:, :, None, :]
    re = jnp.concatenate([first, second, third], axis=2).reshape(B, -1, 3)
    xin = jnp.transpose(re, (0, 2, 1)).astype(jnp.float32)       # (B, 3, 3N)
    xr = xin.reshape(B, 3, N, 3)                                  # [b, c, n, r]

    h = jnp.einsum("mcr,bcnr->bmn", params["w1"], xr) + params["b1"][None, :, None]
    h = (h - params["m1"][None, :, None]) / jnp.sqrt(params["v1"][None, :, None] + EPS)
    h = h * params["g1"][None, :, None] + params["be1"][None, :, None]
    h = jnp.maximum(h, 0.0)

    y = jnp.einsum("om,bmn->bon", params["w2"][:, :, 0], h) + params["b2"][None, :, None]
    y = (y - params["m2"][None, :, None]) / jnp.sqrt(params["v2"][None, :, None] + EPS)
    y = y * params["g2"][None, :, None] + params["be2"][None, :, None]
    return jnp.maximum(y, 0.0)


if __name__ == "__main__":
    # small shapes: batch=2, faces=16, neighbors-per-face=8, feature=12
    B, N, K = 2, 16, 8
    middle_channels, out_channels = 32, 16

    key = jax.random.PRNGKey(0)
    ks = jax.random.split(key, 12)
    data = jax.random.normal(ks[0], (B, N, K, 12), dtype=jnp.float32)

    params = {
        "w1": 0.2 * jax.random.normal(ks[1], (middle_channels, 3, 3), jnp.float32),
        "b1": 0.1 * jax.random.normal(ks[2], (middle_channels,), jnp.float32),
        "g1": 1.0 + 0.1 * jax.random.normal(ks[3], (middle_channels,), jnp.float32),
        "be1": 0.1 * jax.random.normal(ks[4], (middle_channels,), jnp.float32),
        "m1": 0.1 * jax.random.normal(ks[5], (middle_channels,), jnp.float32),
        "v1": 1.0 + 0.5 * jax.random.uniform(ks[6], (middle_channels,), jnp.float32),
        "w2": 0.2 * jax.random.normal(ks[7], (out_channels, middle_channels, 1), jnp.float32),
        "b2": 0.1 * jax.random.normal(ks[8], (out_channels,), jnp.float32),
        "g2": 1.0 + 0.1 * jax.random.normal(ks[9], (out_channels,), jnp.float32),
        "be2": 0.1 * jax.random.normal(ks[10], (out_channels,), jnp.float32),
        "m2": 0.1 * jax.random.normal(ks[11], (out_channels,), jnp.float32),
        "v2": 1.3 * jnp.ones((out_channels,), jnp.float32),
    }

    out = geodesic_forward(data, params)
    jax.block_until_ready(out)

    ref = geodesic_reference(data, params)
    assert out.shape == (B, out_channels, N), out.shape
    max_err = float(jnp.max(jnp.abs(out - ref)))
    # MXU operands are bf16 (per perf review); tolerance scaled to output magnitude
    tol = 2e-2 * float(jnp.max(jnp.abs(ref))) + 1e-3
    assert max_err < tol, f"mismatch vs reference: {max_err} (tol {tol})"
    print("KERNEL_OK")
</pallas_src>

<mosaic_0001>
module attributes {stable_mosaic.version = 11 : i64} {
  func.func @_geodesic_kernel(%arg0: i32, %arg1: i32, %arg2: memref<1x16x96xf32, #tpu.memory_space<vmem>>, %arg3: memref<32x96xbf16, #tpu.memory_space<vmem>>, %arg4: memref<32x1xf32, #tpu.memory_space<vmem>>, %arg5: memref<16x32xbf16, #tpu.memory_space<vmem>>, %arg6: memref<16x1xf32, #tpu.memory_space<vmem>>, %arg7: memref<1x16x16xf32, #tpu.memory_space<vmem>>) attributes {dimension_semantics = [#tpu.dimension_semantics<parallel>, #tpu.dimension_semantics<parallel>], iteration_bounds = array<i64: 2, 1>, scalar_prefetch = 0 : i64, scratch_operands = 0 : i64, tpu.core_type = #tpu.core_type<tc>, window_params = [{transform_indices = @transform_0, window_bounds = array<i64: 1, 16, 96>}, {pipeline_mode = #tpu.pipeline_mode<synchronous>, transform_indices = @transform_1, window_bounds = array<i64: 32, 96>}, {pipeline_mode = #tpu.pipeline_mode<synchronous>, transform_indices = @transform_2, window_bounds = array<i64: 32, 1>}, {pipeline_mode = #tpu.pipeline_mode<synchronous>, transform_indices = @transform_3, window_bounds = array<i64: 16, 32>}, {pipeline_mode = #tpu.pipeline_mode<synchronous>, transform_indices = @transform_4, window_bounds = array<i64: 16, 1>}, {transform_indices = @transform_5, window_bounds = array<i64: 1, 16, 16>}]} {
    %c0 = arith.constant 0 : index
    %c0_0 = arith.constant 0 : index
    %c0_1 = arith.constant 0 : index
    %0 = vector.load %arg2[%c0, %c0_0, %c0_1] : memref<1x16x96xf32, #tpu.memory_space<vmem>>, vector<1x16x96xf32>
    %1 = vector.shape_cast %0 : vector<1x16x96xf32> to vector<16x96xf32>
    %2 = vector.extract_strided_slice %1 {offsets = [0, 3], sizes = [16, 93], strides = [1, 1]} : vector<16x96xf32> to vector<16x93xf32>
    %3 = vector.extract_strided_slice %1 {offsets = [0, 0], sizes = [16, 3], strides = [1, 1]} : vector<16x96xf32> to vector<16x3xf32>
    %4 = tpu.concatenate %2, %3 in 1 : vector<16x93xf32>, vector<16x3xf32> -> vector<16x96xf32>
    %5 = tpu.iota {dimensions = array<i32: 1>} : vector<16x96xi32>
    %c12_i32 = arith.constant 12 : i32
    %c0_i32 = arith.constant 0 : i32
    %6 = arith.cmpi eq, %c12_i32, %c0_i32 : i32
    %c1_i32 = arith.constant 1 : i32
    %7 = arith.select %6, %c1_i32, %c12_i32 : i32
    %8 = vector.broadcast %7 : i32 to vector<16x96xi32>
    %9 = arith.remsi %5, %8 : vector<16x96xi32>
    %c0_i32_2 = arith.constant 0 : i32
    %10 = vector.broadcast %c0_i32_2 : i32 to vector<16x96xi32>
    %11 = arith.cmpi ne, %9, %10 : vector<16x96xi32>
    %c0_i32_3 = arith.constant 0 : i32
    %12 = vector.broadcast %c0_i32_3 : i32 to vector<16x96xi32>
    %13 = arith.cmpi slt, %9, %12 : vector<16x96xi32>
    %c0_i32_4 = arith.constant 0 : i32
    %14 = arith.cmpi slt, %7, %c0_i32_4 : i32
    %15 = vector.broadcast %14 : i1 to vector<16x96xi1>
    %16 = vector.broadcast %15 : vector<16x96xi1> to vector<16x96xi1>
    %17 = arith.xori %13, %16 : vector<16x96xi1>
    %18 = arith.andi %17, %11 : vector<16x96xi1>
    %19 = vector.broadcast %7 : i32 to vector<16x96xi32>
    %20 = arith.addi %9, %19 : vector<16x96xi32>
    %21 = arith.select %18, %20, %9 : vector<16x96xi1>, vector<16x96xi32>
    %c3_i32 = arith.constant 3 : i32
    %22 = vector.broadcast %c3_i32 : i32 to vector<16x96xi32>
    %23 = arith.cmpi slt, %21, %22 : vector<16x96xi32>
    %24 = arith.subf %1, %4 : vector<16x96xf32>
    %25 = math.absf %24 : vector<16x96xf32>
    %26 = arith.select %23, %25, %1 : vector<16x96xi1>, vector<16x96xf32>
    %27 = arith.truncf %26 : vector<16x96xf32> to vector<16x96xbf16>
    %c0_5 = arith.constant 0 : index
    %c0_6 = arith.constant 0 : index
    %28 = vector.load %arg3[%c0_5, %c0_6] : memref<32x96xbf16, #tpu.memory_space<vmem>>, vector<32x96xbf16>
    %cst = arith.constant dense<0.000000e+00> : vector<32x16xf32>
    %29 = tpu.matmul %28, %27, %cst {dimension_numbers = #tpu.dot_dimension_numbers<[1], [1], [0], [0], [0, 0, 1, 0], [], []>} : vector<32x96xbf16>, vector<16x96xbf16>, vector<32x16xf32> -> vector<32x16xf32>
    %c0_7 = arith.constant 0 : index
    %c0_8 = arith.constant 0 : index
    %30 = vector.load %arg4[%c0_7, %c0_8] : memref<32x1xf32, #tpu.memory_space<vmem>>, vector<32x1xf32>
    %31 = vector.broadcast %30 : vector<32x1xf32> to vector<32x16xf32>
    %32 = arith.addf %29, %31 : vector<32x16xf32>
    %cst_9 = arith.constant 0.000000e+00 : f32
    %33 = vector.broadcast %cst_9 : f32 to vector<32x16xf32>
    %34 = arith.maximumf %32, %33 : vector<32x16xf32>
    %35 = arith.truncf %34 : vector<32x16xf32> to vector<32x16xbf16>
    %c0_10 = arith.constant 0 : index
    %c0_11 = arith.constant 0 : index
    %36 = vector.load %arg5[%c0_10, %c0_11] : memref<16x32xbf16, #tpu.memory_space<vmem>>, vector<16x32xbf16>
    %cst_12 = arith.constant dense<0.000000e+00> : vector<16x16xf32>
    %37 = tpu.matmul %36, %35, %cst_12 {dimension_numbers = #tpu.dot_dimension_numbers<[1], [0], [0], [1], [0, 0, 1, 1], [], []>} : vector<16x32xbf16>, vector<32x16xbf16>, vector<16x16xf32> -> vector<16x16xf32>
    %c0_13 = arith.constant 0 : index
    %c0_14 = arith.constant 0 : index
    %38 = vector.load %arg6[%c0_13, %c0_14] : memref<16x1xf32, #tpu.memory_space<vmem>>, vector<16x1xf32>
    %39 = vector.broadcast %38 : vector<16x1xf32> to vector<16x16xf32>
    %40 = arith.addf %37, %39 : vector<16x16xf32>
    %cst_15 = arith.constant 0.000000e+00 : f32
    %41 = vector.broadcast %cst_15 : f32 to vector<16x16xf32>
    %42 = arith.maximumf %40, %41 : vector<16x16xf32>
    %c0_16 = arith.constant 0 : index
    %c0_17 = arith.constant 0 : index
    %c0_18 = arith.constant 0 : index
    %43 = vector.load %arg7[%c0_16, %c0_17, %c0_18] : memref<1x16x16xf32, #tpu.memory_space<vmem>>, vector<1x16x16xf32>
    %44 = vector.shape_cast %43 : vector<1x16x16xf32> to vector<16x16xf32>
    %45 = vector.shape_cast %42 : vector<16x16xf32> to vector<1x16x16xf32>
    tpu.vector_store %arg7[%c0_16, %c0_17, %c0_18], %45 {strides = array<i32>} : memref<1x16x16xf32, #tpu.memory_space<vmem>>, vector<1x16x16xf32>,
    return
  }
  func.func @transform_0(%arg0: i32, %arg1: i32) -> (i32, i32, i32) {
    %c0_i32 = arith.constant 0 : i32
    %c0_i32_0 = arith.constant 0 : i32
    return %arg0, %arg1, %c0_i32 : i32, i32, i32
  }
  func.func @transform_1(%arg0: i32, %arg1: i32) -> (i32, i32) {
    %c0_i32 = arith.constant 0 : i32
    %c0_i32_0 = arith.constant 0 : i32
    %c0_i32_1 = arith.constant 0 : i32
    return %c0_i32, %c0_i32_0 : i32, i32
  }
  func.func @transform_2(%arg0: i32, %arg1: i32) -> (i32, i32) {
    %c0_i32 = arith.constant 0 : i32
    %c0_i32_0 = arith.constant 0 : i32
    %c0_i32_1 = arith.constant 0 : i32
    return %c0_i32, %c0_i32_0 : i32, i32
  }
  func.func @transform_3(%arg0: i32, %arg1: i32) -> (i32, i32) {
    %c0_i32 = arith.constant 0 : i32
    %c0_i32_0 = arith.constant 0 : i32
    %c0_i32_1 = arith.constant 0 : i32
    return %c0_i32, %c0_i32_0 : i32, i32
  }
  func.func @transform_4(%arg0: i32, %arg1: i32) -> (i32, i32) {
    %c0_i32 = arith.constant 0 : i32
    %c0_i32_0 = arith.constant 0 : i32
    %c0_i32_1 = arith.constant 0 : i32
    return %c0_i32, %c0_i32_0 : i32, i32
  }
  func.func @transform_5(%arg0: i32, %arg1: i32) -> (i32, i32, i32) {
    %c0_i32 = arith.constant 0 : i32
    %c0_i32_0 = arith.constant 0 : i32
    return %arg0, %c0_i32, %arg1 : i32, i32, i32
  }
}

</mosaic_0001>

<bundles_post_ra>
// kernel: tpu_custom_call.1
= control target key start
LH: loop header
LB: loop body
LE: loop exit
PB: predicated region body
PF: predicated region fallthrough
CT: control target
= control target key end

     0   :  { %10 = vsyncpa [#allocation3], 0  ;;  %s1033_s0 = inlined_call_operand.vmem [shape: f32[2,16,96], index: 0, kind: input, shape index: {}]   ;;  %s1034_s1 = inlined_call_operand.vmem [shape: bf16[32,96], index: 1, kind: input, shape index: {}]   ;;  %s1035_s2 = inlined_call_operand.vmem [shape: f32[32,1], index: 2, kind: input, shape index: {}]   ;;  %s1036_s3 = inlined_call_operand.hbm [shape: bf16[16,32], index: 3, kind: input, shape index: {}]   ;;  %s1037_s4 = inlined_call_operand.vmem [shape: f32[16,1], index: 4, kind: input, shape index: {}]   ;;  %s1038_s5 = inlined_call_operand.hbm [shape: f32[2,16,16], index: 5, kind: output, shape index: {}]  }
   0x1   :  { %11 = vsyncpa [#allocation4], 0 }
   0x2   :  { %13 = vsyncpa [#allocation4 + $0x1], 0  ;;  %s866_s18 = smov 0   ;;  %s868_s19 = smov 0  }
   0x3   :  { %s870_s20 = smov 0   ;;  %s872_s21 = smov 0  }
   0x4   :  { %s874_s22 = smov 0   ;;  %s876_s23 = smov 0  }
   0x5 LB: > { %s591_s24 = sadd.s32 4294967295, %s823_s23   ;;  %s592_s25 = sadd.s32 4294967294, %s823_s23   ;;  %s823_s23 = sphi %s876_s23, %s19_s23   ;;  %s819_s22 = sphi %s874_s22, %s1047_s22   ;;  %s815_s21 = sphi %s872_s21, %s1046_s21   ;;  %s811_s20 = sphi %s870_s20, %s1045_s20   ;;  %s807_s19 = sphi %s868_s19, %s1044_s19   ;;  %s803_s18 = sphi %s866_s18, %s1043_s18  }
   0x6   : > { %s31_s26 = sadd.s32 1, %s819_s22  ;;  %s152_s27 = sadd.s32 1, %s811_s20 }
   0x7   : > { %p33_p0 = scmp.ge.s32.totalorder %s31_s26, 2  ;;  %p162_p1 = scmp.ne.s32.totalorder %s811_s20, %s807_s19 }
   0x8   : > { %p163_p2 = scmp.eq.s32.totalorder %s591_s24, 1  ;;  %p168_p3 = scmp.ne.s32.totalorder %s807_s19, %s803_s18 }
   0x9   : > { %s1049_s26 = smov (%p33_p0, %s31_s26), 0  ;;  %p169_p5 = scmp.eq.s32.totalorder %s592_s25, 1 }
   0xa   : > { %p906_p4 = por %p163_p2, %p162_p1  ;;  %s147_s29 = ssub.s32 %s819_s22, %s1049_s26 }
   0xb   : > { %p593_p6 = scmp.ge.s32.totalorder %s823_s23, 1  ;;  %p150_p7 = scmp.eq.s32.totalorder %s147_s29, 0 }
   0xc   : > { %p913_p8 = por %p169_p5, %p168_p3  ;;  %p176_p9 = scmp.lt.s32.totalorder %s823_s23, 3 }
   0xd   : > { %s919_s6 = scalar_select %p150_p7, %s811_s20, %s152_s27  }
   0xe   : > { %p921_p10 = pnand %p593_p6, %p176_p9  ;;  %p925_p11 = scmp.eq.s32.totalorder %s591_s24, 0 }
   0xf   : > { %s825_s9 = smov [#allocation2]  }
  0x10   : > { %p643_p12 = pneg %p921_p10  ;;  %s194_s10 = sshll.u32 %s825_s9, 4  ;;  %s195_s10 = int_to_ptr.vmem [resolvable:$true] %s194_s10 }
  0x11   : > { %s728_s11 = scalar_lea.vmem %s195_s10, 128  ;;  %p736_p5 = scmp.lt.s32.totalorder %s195_s10, %s195_s10 }
  0x12   : > { %p644_p13 = pnand %p925_p11, %p643_p12  ;;  %p729_p1 = scmp.ne.s32.totalorder %s195_s10, %s728_s11 }
  0x13   : > { %p737_p6 = scmp.lt.s32.totalorder %s728_s11, %s728_s11 }
  0x14   : > { %p719_p0 = pneg %p644_p13 }
  0x15   : > { %p738_p7 = por %p737_p6, %p736_p5 }
  0x16   : > { %p731_p2 = pnand %p729_p1, %p719_p0 }
  0x18   : > { %p732_p3 = pneg %p731_p2 }
  0x1a   : > { %p739_p9 = pnand %p738_p7, %p732_p3 }
  0x1c   : > { %742 = shalt.err (!%p739_p9)
}
  0x1d   : > { %s826_s12 = smov 64   ;;  %s827_s13 = smov 4  }
  0x1e   : > { %646 = dma.hbm_to_vmem [thread:$0]  (!%p644_p13), %s1036_s3, 128, %s195_s10, [#allocation3], %s826_s12, %s826_s12, %s827_s13  }
  0x1f   : > { %226 = sbr.rel (%p921_p10) target bundleno = 604 (0x25c), region = 40 }
  0x24   : > { %794 = dma.done.wait (%p925_p11), [#allocation3], 128  }
  0x25   : > { %796 = vsyncadd (%p925_p11), [#allocation3], 4294967168  ;;  %p259_p12 = scmp.lt.s32.totalorder %s815_s21, 1  ;;  %s828_s29 = smov 93   ;;  %v714_v1 = vld [vmem:[%s1034_s1] sm:$0xff]   ;;  %vm352_vm0 = vcmask 785408   ;;  %v288_v10 = vlaneseq }
  0x26   : > { %s829_s7 = smov 125   ;;  %622 = vmatprep.mubr.msk.bf16.mxu0 %vm352_vm0, %v714_v1  ;;  %v321_v3 = vld [vmem:[%s1035_s2 + $0x18] sm:$0xff]  ;;  %v320_v4 = vld [vmem:[%s1035_s2 + $0x10] sm:$0xff]  ;;  %v830_v5 = vmov 0   ;;  %v318_v6 = vld [vmem:[%s1035_s2] sm:$0xff]  ;;  %vm285_vm1 = vcmask 760832  }
  0x27   : > { %s260_s16 = scalar_select %p259_p12, %s815_s21, 1  ;;  %713 = vset.pattern.permute.xlu1 %v830_v5  ;;  %712 = vset.pattern.permute.xlu0 %v830_v5  ;;  %v319_v7 = vld [vmem:[%s1035_s2 + $0x8] sm:$0xff]  ;;  %v419_v8 = vld [vmem:[%s1037_s4] sm:$0xff]  ;;  %v289_v11 = vand.u32 127, %v288_v10  ;;  %v831_v34 = vmov 0.0   ;;  %vm832_vm6 = vmmov 0  }
  0x28   : > { %v420_v9 = vld [vmem:[%s1037_s4 + $0x8] sm:$0xff]  ;;  %626 = vmatprep.subr.bf16.mxu1 %v831_v34  ;;  %630 = vmatprep.mubr.msk.bf16.mxu1 %vm832_vm6, %v831_v34  ;;  %v716_v53 = vld [vmem:[#allocation2] sm:$0xff]   ;;  %vm436_vm7 = vcmask 261120   ;;  %s255_s10 = sand.u32 1, %s807_s19   ;;  %vm483_vm8 = vcmask 130048   ;;  %s613_s13 = sshll.u32 %s815_s21, 8 }
  0x29   : > { %s612_s17 = sshll.u32 %s260_s16, 4  ;;  %v969_v12 = vmul.u32.u64.low 2863311531, %v289_v11  ;;  %v970_v13 = vmul.u32.u64.high 2863311531, %v289_v11, %v969_v12  ;;  %v715_v33 = vld [vmem:[%s1034_s1 + $0x8] sm:$0xff]   ;;  %s598_s8 = sshll.u32 %s255_s10, 4 }
  0x2a   : > { %s266_s27 = scalar_lea.vmem %s1033_s0, %s612_s17  ;;  %s257_s11 = scalar_lea.vmem [#allocation5], %s598_s8 }
  0x2b   : > { %v269_v0 = vld [vmem:[%s266_s27] sm:$0xff]  ;;  %v270_v2 = vld [vmem:[%s266_s27 + $0x8] sm:$0xff]  ;;  %v296_v14 = vshrl.u32 %v970_v13, 3  ;;  %s501_s12 = sshll.u32 %s257_s11, 4  ;;  %s984_s16 = scalar_lea.hbm %s1038_s5, %s613_s13  ;;  %s986_s12 = int_to_ptr.vmem [resolvable:$true] %s501_s12 }
  0x2c   : > { %279 = vrot.lane.b32.xlu1 %v269_v0, %s828_s29  ;;  %273 = vrot.lane.b32.xlu0 %v269_v0, %s829_s7  ;;  %s988_s17 = scalar_lea.sflag [#allocation4], %s255_s10  ;;  %s743_s21 = scalar_lea.vmem %s986_s12, 256 }
  0x2d   : > { %v297_v15 = vmul.u32 12, %v296_v14  ;;  %p744_p10 = scmp.ne.s32.totalorder %s986_s12, %s743_s21  ;;  %s833_s24 = smov [#allocation5]  }
  0x2e   : > { %s747_s25 = sshll.u32 %s833_s24, 4  ;;  %s748_s25 = int_to_ptr.vmem [resolvable:$false] %s747_s25 }
  0x2f   : > { %v298_v16 = vsub.s32 %v289_v11, %v297_v15  ;;  %p745_p11 = pnand %p744_p10, %p906_p4  ;;  %s749_s27 = scalar_lea.vmem %s748_s25, 512 }
  0x30   : > { %281 = vrot.lane.b32.xlu1 %v270_v2, %s828_s29  ;;  %275 = vrot.lane.b32.xlu0 %v270_v2, %s829_s7  ;;  %p750_p0 = scmp.lt.s32.totalorder %s986_s12, %s748_s25  ;;  %p751_p1 = scmp.lt.s32.totalorder %s749_s27, %s743_s21 }
  0x31   : > { %vm301_vm2 = vcmp.ne.s32.totalorder %v298_v16, 0  ;;  %vm302_vm3 = vcmp.lt.s32.totalorder %v298_v16, 0  ;;  %v304_v19 = vadd.s32 12, %v298_v16  ;;  %p746_p13 = pneg %p745_p11 }
  0x32   : > { %vm303_vm4 = vmand %vm302_vm3, %vm301_vm2  ;;  %p752_p2 = por %p751_p1, %p750_p0 }
  0x33   : > { %v305_v24 = vsel %vm303_vm4, %v304_v19, %v298_v16 }
  0x34   : > { %339 = vperm.xlu1 %713, %v321_v3   ;;  %334 = vperm.xlu0 %712, %v320_v4   ;;  %vm306_vm5 = vcmp.lt.s32.totalorder %v305_v24, 3  ;;  %p753_p3 = pnand %p752_p2, %p746_p13 }
  0x38   : > { %324 = vperm.xlu1 %713, %v318_v6   ;;  %329 = vperm.xlu0 %712, %v319_v7  }
  0x3c   : > { %423 = vperm.xlu1 %713, %v419_v8   ;;  %428 = vperm.xlu0 %712, %v420_v9  }
  0x9e   : > { %v280_v17 = vpop.permute.xlu1 %279  ;;  %v274_v18 = vpop.permute.xlu0 %273 }
  0x9f   : > { %v286_v20 = vsel %vm285_vm1, %v274_v18, %v280_v17 }
  0xa0   : > { %v307_v21 = vsub.f32 %v269_v0, %v286_v20 }
  0xa2   : > { %v282_v22 = vpop.permute.xlu1 %281  ;;  %v276_v23 = vpop.permute.xlu0 %275  ;;  %v309_v26 = vand.u32 2147483647, %v307_v21 }
  0xa3   : > { %v287_v25 = vsel %vm285_vm1, %v276_v23, %v282_v22 }
  0xa4   : > { %v308_v27 = vsub.f32 %v270_v2, %v287_v25  ;;  %v311_v29 = vsel %vm306_vm5, %v309_v26, %v269_v0 }
  0xa6   : > { %v310_v28 = vand.u32 2147483647, %v308_v27 }
  0xa8   : > { %v312_v30 = vsel %vm306_vm5, %v310_v28, %v270_v2 }
  0xa9   : > { %v313_v31 = vpack.c.bf16 %v312_v30, %v311_v29 }
  0xab   : > { %634 = vmatprep.subr.msk.bf16.mxu0 %vm352_vm0, %v313_v31  ;;  %v360_v32 = vsel %vm352_vm0, %v313_v31, 0 }
  0xac   : > { %621 = vmatpush3.bf16.xpose.msra.mxu0 %v360_v32 }
  0xaf   : > { %v340_v35 = vpop.permute.xlu1 %339  ;;  %v335_v36 = vpop.permute.xlu0 %334 }
  0xb3   : > { %623 = vmatmul.mubr.msk.bf16.vlgmr.msra.gmra.mxu0 %vm352_vm0, %v715_v33  ;;  %v325_v41 = vpop.permute.xlu1 %324  ;;  %v330_v43 = vpop.permute.xlu0 %329 }
  0xb7   : > { %v424_v54 = vpop.permute.xlu1 %423  ;;  %v429_v59 = vpop.permute.xlu0 %428 }
 0x173   : > { %v624_v37 = vpop.f32.mrf.mxu0 }
 0x174   : > { %v405_v39 = vadd.f32 %v624_v37, %v335_v36 }
 0x175   : > { %v396_v38 = vpop.f32.mrf.mxu0 }
 0x176   : > { %v413_v45 = vmax.f32 %v405_v39, 0.0  ;;  %v397_v46 = vadd.f32 %v396_v38, %v325_v41 }
 0x177   : > { %v625_v40 = vpop.f32.mrf.mxu0 }
 0x178   : > { %v408_v42 = vadd.f32 %v625_v40, %v340_v35  ;;  %v411_v51 = vmax.f32 %v397_v46, 0.0 }
 0x179   : > { %v399_v44 = vpop.f32.mrf.mxu0 }
 0x17a   : > { %v414_v47 = vmax.f32 %v408_v42, 0.0  ;;  %v400_v48 = vadd.f32 %v399_v44, %v330_v43 }
 0x17c   : > { %v412_v49 = vmax.f32 %v400_v48, 0.0  ;;  %v416_v50 = vpack.c.bf16 %v414_v47, %v413_v45 }
 0x17e   : > { %627 = vmatpush3.bf16.msra.mxu1 %v416_v50  ;;  %v415_v52 = vpack.c.bf16 %v412_v49, %v411_v51 }
 0x17f   : > { %628 = vmatprep.subr.bf16.mxu1 %v831_v34 }
 0x182   : > { %629 = vmatpush3.bf16.msra.mxu1 %v415_v52 }
 0x185   : > { %631 = vmatmul.mubr.msk.bf16.vlgmr.msra.gmra.mxu1 %vm436_vm7, %v716_v53 }
 0x245   : > { %v474_v55 = vpop.f32.mrf.mxu1 }
 0x246   : > { %v475_v56 = vadd.f32 %v474_v55, %v424_v54 }
 0x247   : > { %v632_v57 = vpop.f32.mrf.mxu1 }
 0x248   : > { %v481_v58 = vmax.f32 %v475_v56, 0.0 }
 0x249   : > { %v477_v60 = vpop.f32.mrf.mxu1 }
 0x24a   : > { %484 = vst.msk [vmem:[%s257_s11] sm:$0xff] %vm483_vm8, %v481_v58  ;;  %v478_v61 = vadd.f32 %v477_v60, %v429_v59 }
 0x24b   : > { %v633_v62 = vpop.f32.mrf.mxu1 }
 0x24c   : > { %v482_v63 = vmax.f32 %v478_v61, 0.0 }
 0x24e   : > { %485 = vst.msk [vmem:[%s257_s11 + $0x8] sm:$0xff] %vm483_vm8, %v482_v63 }
 0x24f   : > { %756 = shalt.err (!%p753_p3)
}
 0x250   : > { %s757_s29 = scalar_lea.hbm %s984_s16, 256  ;;  %s761_s10 = scalar_lea.hbm %s1038_s5, 512 }
 0x251   : > { %p758_p5 = scmp.ne.s32.totalorder %s984_s16, %s757_s29  ;;  %p762_p9 = scmp.lt.s32.totalorder %s984_s16, %s1038_s5 }
 0x252   : > { %p763_p12 = scmp.lt.s32.totalorder %s761_s10, %s757_s29 }
 0x253   : > { %p759_p6 = pnand %p758_p5, %p906_p4 }
 0x254   : > { %p764_p10 = por %p763_p12, %p762_p9 }
 0x255   : > { %p760_p7 = pneg %p759_p6 }
 0x257   : > { %p765_p11 = pnand %p764_p10, %p760_p7 }
 0x259   : > { %768 = shalt.err (!%p765_p11)
}
 0x25a   : > { %s834_s13 = smov 128   ;;  %s835_s14 = smov 8  }
 0x25b   : > { %641 = dma.vmem_to_hbm [thread:$0]  (%p906_p4), %s986_s12, 256, %s984_s16, %s988_s17, %s834_s13, %s834_s13, %s835_s14  }
 0x25c PF: > { %p653_p13 = scmp.ge.s32.totalorder %s823_s23, 2  ;;  %s516_s15 = sand.u32 1, %s803_s18  }
 0x25d   : > { %s517_s21 = scalar_lea.sflag [#allocation4], %s516_s15 }
 0x25e   : > { %p648_p0 = pnand %p653_p13, %p913_p8 }
 0x260   : > { %p649_p1 = pneg %p648_p0 }
 0x262   : > { %798 = dma.done.wait (%p649_p1), %s517_s21, 256  }
 0x263   : > { %800 = vsyncadd (%p649_p1), %s517_s21, 4294967040  ;;  %s19_s23 = sadd.s32 1, %s823_s23   ;;  %s1043_s18 = smov %s807_s19 }
 0x264   : > { %p16_p2 = scmp.ge.s32.totalorder %s19_s23, 4   ;;  %s1044_s19 = smov %s811_s20 }
 0x265   : > { %s1045_s20 = smov %s919_s6  ;;  %s1046_s21 = smov %s819_s22 }
 0x266   : > { %s1047_s22 = smov %s1049_s26  ;;  %18 = sbr.rel (!%p16_p2) target bundleno = 5 (0x5), region = 80 }
 0x26b   :  { %522 = vsyncpa [#allocation3], 1 }
 0x26c   :  { %524 = vsyncpa [#allocation3 + $0x1], 1 }
 0x26d   :  { %525 = vsyncpa [#allocation4], 1 }
 0x26e   :  { %527 = vsyncpa [#allocation4 + $0x1], 1 }

</bundles_post_ra>
